<compile_context>
chip_gen: v5e
topology: v5e:2x2
jax: 0.10.0
libtpu: 0.0.40
codegen_flags: <defaults>
</compile_context>

<pallas_src>
import jax
import jax.numpy as jnp
from jax.experimental import pallas as pl
from jax.experimental.pallas import tpu as pltpu

LANES = 128


def _round_up(x, m):
    return ((x + m - 1) // m) * m


def _cdiv(a, b):
    return -(-a // b)


def _choose_tiles(m, row_align=16, max_tile=2048, split_threshold=64):
    """Pick (rows-per-tile, n_tiles).

    Tiles are large (<= max_tile rows) to amortize the ~0.35us per-grid-step
    overhead, but we force >=2 tiles whenever there is enough work so the
    "parallel" grid axis can shard across both v7x TensorCores."""
    m_pad = _round_up(max(m, row_align), row_align)
    n_tiles = _cdiv(m_pad, max_tile)
    if n_tiles < 2 and m_pad >= split_threshold:
        n_tiles = 2
    tm = _round_up(_cdiv(m_pad, n_tiles), row_align)
    return tm, n_tiles


# ----------------------------------------------------------------------------
# Pallas kernels
# ----------------------------------------------------------------------------
def _conv_pool_kernel(p_ref, w_ref, b_ref, o_ref):
    """Fused conv(matmul) + 2x2 max-pool + bias + ReLU.

    p_ref: (4*tm, K) bf16 -- rows ordered (pool-position, row-within-tile)
    w_ref: (K, 128)  bf16 -- (kh,kw,c)-major conv weight, OC padded to 128 lanes
    b_ref: (1, 128)  f32
    o_ref: (tm, 128) bf16 -- rows ordered (n, ph, pw), lanes = padded OC
    """
    tm = o_ref.shape[0]
    # Single MXU matmul per tile (one weight push), f32 accumulation.
    y = jnp.dot(p_ref[...], w_ref[...], preferred_element_type=jnp.float32)
    # 2x2 max-pool: elementwise max of the 4 pool-window slabs (static,
    # vreg-aligned sublane slices since tm is a multiple of 16).
    y = jnp.maximum(jnp.maximum(y[:tm], y[tm:2 * tm]),
                    jnp.maximum(y[2 * tm:3 * tm], y[3 * tm:]))
    # bias + ReLU (valid to apply after the max: per-channel bias + monotone ReLU
    # commute with max).
    y = jnp.maximum(y + b_ref[...], 0.0)
    o_ref[...] = y.astype(o_ref.dtype)


def _fc_kernel(x_ref, w1_ref, b1_ref, w2_ref, b2_ref, o_ref):
    """Fused fc1 + ReLU + fc2; the (tm, 128) intermediate stays in VMEM."""
    h = jnp.dot(x_ref[...], w1_ref[...], preferred_element_type=jnp.float32)
    h = jnp.maximum(h + b1_ref[...], 0.0)
    y = jnp.dot(h.astype(jnp.bfloat16), w2_ref[...],
                preferred_element_type=jnp.float32)
    o_ref[...] = (y + b2_ref[...]).astype(o_ref.dtype)


# ----------------------------------------------------------------------------
# pallas_call wrappers
# ----------------------------------------------------------------------------
def conv_relu_pool(patches, w_mat, bias, tm, n_tiles):
    """patches (n_tiles*4*tm, K) bf16, w_mat (K, 128) bf16, bias (1, 128) f32
    -> (n_tiles*tm, 128) bf16 pooled/activated output."""
    _, kk = patches.shape
    m_pad = tm * n_tiles
    return pl.pallas_call(
        _conv_pool_kernel,
        out_shape=jax.ShapeDtypeStruct((m_pad, LANES), jnp.bfloat16),
        grid=(n_tiles,),
        in_specs=[
            pl.BlockSpec((4 * tm, kk), lambda i: (i, 0)),
            pl.BlockSpec((kk, LANES), lambda i: (0, 0)),
            pl.BlockSpec((1, LANES), lambda i: (0, 0)),
        ],
        out_specs=pl.BlockSpec((tm, LANES), lambda i: (i, 0)),
        compiler_params=pltpu.CompilerParams(
            dimension_semantics=("parallel",)),
    )(patches, w_mat, bias)


def fc_fused(x, w1, b1, w2, b2, tm, n_tiles):
    """x (n_tiles*tm, K) bf16 -> (n_tiles*tm, 128) f32 logits (lane-padded)."""
    m_pad, kk = x.shape
    return pl.pallas_call(
        _fc_kernel,
        out_shape=jax.ShapeDtypeStruct((m_pad, LANES), jnp.float32),
        grid=(n_tiles,),
        in_specs=[
            pl.BlockSpec((tm, kk), lambda i: (i, 0)),
            pl.BlockSpec((kk, LANES), lambda i: (0, 0)),
            pl.BlockSpec((1, LANES), lambda i: (0, 0)),
            pl.BlockSpec((LANES, LANES), lambda i: (0, 0)),
            pl.BlockSpec((1, LANES), lambda i: (0, 0)),
        ],
        out_specs=pl.BlockSpec((tm, LANES), lambda i: (i, 0)),
        compiler_params=pltpu.CompilerParams(
            dimension_semantics=("parallel",)),
    )(x, w1, b1, w2, b2)


# ----------------------------------------------------------------------------
# Wrapper-side layout helpers (pure data rearrangement, XLA)
# ----------------------------------------------------------------------------
def _pool_out_hw(h, w, k):
    return (h - k + 1) // 2, (w - k + 1) // 2


def _pool_window_patches(x_nhwc, k, tm, n_tiles):
    """(N,H,W,C) bf16 -> (n_tiles*4*tm, K) bf16 im2col patches.

    Rows are grouped (tile, pool-position, row-within-tile); row order within a
    tile follows the original (n, ph, pw) order. Columns are (kh, kw, c)-major
    with K = k*k*C (NO zero-padding of K). Extra rows (M..n_tiles*tm-1) are zero."""
    n, h, w, c = x_nhwc.shape
    oh, ow = h - k + 1, w - k + 1
    ph, pw = oh // 2, ow // 2
    cols = [x_nhwc[:, kh:kh + oh, kw:kw + ow, :]
            for kh in range(k) for kw in range(k)]
    pat = jnp.concatenate(cols, axis=-1)                # (N, OH, OW, K*K*C)
    ck = k * k * c
    pat = pat.reshape(n, ph, 2, pw, 2, ck)
    pat = pat.transpose(2, 4, 0, 1, 3, 5)               # (2, 2, N, PH, PW, CK)
    pat = pat.reshape(4, n * ph * pw, ck)                # (4, M, CK)
    m = n * ph * pw
    m_pad = tm * n_tiles
    pat = jnp.pad(pat, ((0, 0), (0, m_pad - m), (0, 0)))
    pat = pat.reshape(4, n_tiles, tm, ck).transpose(1, 0, 2, 3)
    return pat.reshape(n_tiles * 4 * tm, ck)


def _conv_weight_mat(w_oikk):
    oc, ic, kh, kw = w_oikk.shape
    wm = jnp.transpose(w_oikk, (2, 3, 1, 0)).reshape(kh * kw * ic, oc)
    wm = jnp.pad(wm, ((0, 0), (0, LANES - oc)))          # K stays unpadded
    return wm.astype(jnp.bfloat16)


def _fc1_weight_mat(w_oi, ph, pw, c):
    """PyTorch fc1 rows index a (c,h,w)-ordered flatten; our activation flatten
    is (h,w,c)-ordered, so permute the weight's input dim once (free, one-time)."""
    o, i = w_oi.shape
    w_hwc = w_oi.reshape(o, c, ph, pw).transpose(0, 2, 3, 1).reshape(o, i)
    wm = jnp.pad(w_hwc.T, ((0, 0), (0, LANES - o)))
    return wm.astype(jnp.bfloat16)


def _fc2_weight_mat(w_oi):
    o, i = w_oi.shape
    wm = jnp.pad(w_oi.T, ((0, LANES - i), (0, LANES - o)))
    return wm.astype(jnp.bfloat16)


def _pad_bias(b):
    return jnp.pad(b, (0, LANES - b.shape[0])).reshape(1, LANES).astype(jnp.float32)


# ----------------------------------------------------------------------------
# LeNet parameters (deterministic synthetic init) and forward
# ----------------------------------------------------------------------------
def init_lenet_params(key):
    ks = jax.random.split(key, 4)

    def xavier(k, shape, fan_in, fan_out):
        gain = jnp.sqrt(2.0)  # calculate_gain('relu')
        limit = gain * jnp.sqrt(6.0 / (fan_in + fan_out))
        return jax.random.uniform(k, shape, jnp.float32, -limit, limit)

    return {
        "conv1_w": xavier(ks[0], (6, 3, 5, 5), 3 * 25, 6 * 25),
        "conv1_b": jnp.zeros((6,), jnp.float32),
        "conv2_w": xavier(ks[1], (16, 6, 5, 5), 6 * 25, 16 * 25),
        "conv2_b": jnp.zeros((16,), jnp.float32),
        "fc1_w": xavier(ks[2], (120, 400), 400, 120),   # (out, in) like nn.Linear
        "fc1_b": jnp.zeros((120,), jnp.float32),
        "fc2_w": xavier(ks[3], (10, 120), 120, 10),
        "fc2_b": jnp.zeros((10,), jnp.float32),
    }


def lenet_forward(params, x_nchw):
    n = x_nchw.shape[0]
    # bf16-first: cast before the im2col glue so the largest intermediates are bf16.
    x = jnp.transpose(x_nchw, (0, 2, 3, 1)).astype(jnp.bfloat16)   # (N,32,32,3)
    _, h0, w0, _ = x.shape

    # conv1 + relu + 2x2 maxpool: (N,32,32,3) -> (N,14,14,6)
    ph1, pw1 = _pool_out_hw(h0, w0, 5)
    m1 = n * ph1 * pw1
    tm1, nt1 = _choose_tiles(m1)
    p1 = _pool_window_patches(x, 5, tm1, nt1)
    a1 = conv_relu_pool(p1, _conv_weight_mat(params["conv1_w"]),
                        _pad_bias(params["conv1_b"]), tm1, nt1)
    a1 = a1[:m1].reshape(n, ph1, pw1, LANES)[..., :6]              # (N,14,14,6) bf16

    # conv2 + relu + 2x2 maxpool: -> (N,5,5,16)
    ph2, pw2 = _pool_out_hw(ph1, pw1, 5)
    m2 = n * ph2 * pw2
    tm2, nt2 = _choose_tiles(m2)
    p2 = _pool_window_patches(a1, 5, tm2, nt2)
    a2 = conv_relu_pool(p2, _conv_weight_mat(params["conv2_w"]),
                        _pad_bias(params["conv2_b"]), tm2, nt2)
    a2 = a2[:m2].reshape(n, ph2, pw2, LANES)[..., :16]             # (N,5,5,16) bf16

    # Flatten in (h,w,c) order (no transpose); fc1 weight rows are permuted to match.
    flat = a2.reshape(n, ph2 * pw2 * 16)                           # (N,400) bf16
    tmf, ntf = _choose_tiles(n)
    mf_pad = tmf * ntf
    flat = jnp.pad(flat, ((0, mf_pad - n), (0, 0)))

    out = fc_fused(flat,
                   _fc1_weight_mat(params["fc1_w"], ph2, pw2, 16),
                   _pad_bias(params["fc1_b"]),
                   _fc2_weight_mat(params["fc2_w"]),
                   _pad_bias(params["fc2_b"]),
                   tmf, ntf)
    return out[:n, :10]                                            # (N,10) f32


if __name__ == "__main__":
    key = jax.random.PRNGKey(0)
    k_params, k_x = jax.random.split(key)

    params = init_lenet_params(k_params)
    # fc1 expects 16*5*5 features => input spatial size must be 32x32 (CIFAR-like).
    x = jax.random.normal(k_x, (2, 3, 32, 32), dtype=jnp.float32)

    y = jax.jit(lenet_forward)(params, x)
    y = jax.block_until_ready(y)
    assert y.shape == (2, 10) and y.dtype == jnp.float32
    print("KERNEL_OK")
</pallas_src>

<mosaic_0001>
module attributes {stable_mosaic.version = 11 : i64} {
  func.func @_conv_pool_kernel(%arg0: i32, %arg1: memref<832x75xbf16, #tpu.memory_space<vmem>>, %arg2: memref<75x128xbf16, #tpu.memory_space<vmem>>, %arg3: memref<1x128xf32, #tpu.memory_space<vmem>>, %arg4: memref<208x128xbf16, #tpu.memory_space<vmem>>) attributes {dimension_semantics = [#tpu.dimension_semantics<parallel>], iteration_bounds = array<i64: 2>, scalar_prefetch = 0 : i64, scratch_operands = 0 : i64, tpu.core_type = #tpu.core_type<tc>, window_params = [{transform_indices = @transform_0, window_bounds = array<i64: 832, 75>}, {pipeline_mode = #tpu.pipeline_mode<synchronous>, transform_indices = @transform_1, window_bounds = array<i64: 75, 128>}, {pipeline_mode = #tpu.pipeline_mode<synchronous>, transform_indices = @transform_2, window_bounds = array<i64: 1, 128>}, {transform_indices = @transform_3, window_bounds = array<i64: 208, 128>}]} {
    %c0 = arith.constant 0 : index
    %c0_0 = arith.constant 0 : index
    %0 = vector.load %arg1[%c0, %c0_0] : memref<832x75xbf16, #tpu.memory_space<vmem>>, vector<832x75xbf16>
    %c0_1 = arith.constant 0 : index
    %c0_2 = arith.constant 0 : index
    %1 = vector.load %arg2[%c0_1, %c0_2] : memref<75x128xbf16, #tpu.memory_space<vmem>>, vector<75x128xbf16>
    %cst = arith.constant dense<0.000000e+00> : vector<832x128xf32>
    %2 = tpu.matmul %0, %1, %cst {dimension_numbers = #tpu.dot_dimension_numbers<[1], [0], [0], [1], [0, 0, 1, 1], [], []>} : vector<832x75xbf16>, vector<75x128xbf16>, vector<832x128xf32> -> vector<832x128xf32>
    %3 = vector.extract_strided_slice %2 {offsets = [0, 0], sizes = [208, 128], strides = [1, 1]} : vector<832x128xf32> to vector<208x128xf32>
    %4 = vector.extract_strided_slice %2 {offsets = [208, 0], sizes = [208, 128], strides = [1, 1]} : vector<832x128xf32> to vector<208x128xf32>
    %5 = arith.maximumf %3, %4 : vector<208x128xf32>
    %6 = vector.extract_strided_slice %2 {offsets = [416, 0], sizes = [208, 128], strides = [1, 1]} : vector<832x128xf32> to vector<208x128xf32>
    %7 = vector.extract_strided_slice %2 {offsets = [624, 0], sizes = [208, 128], strides = [1, 1]} : vector<832x128xf32> to vector<208x128xf32>
    %8 = arith.maximumf %6, %7 : vector<208x128xf32>
    %9 = arith.maximumf %5, %8 : vector<208x128xf32>
    %c0_3 = arith.constant 0 : index
    %c0_4 = arith.constant 0 : index
    %10 = vector.load %arg3[%c0_3, %c0_4] : memref<1x128xf32, #tpu.memory_space<vmem>>, vector<1x128xf32>
    %11 = vector.broadcast %10 : vector<1x128xf32> to vector<208x128xf32>
    %12 = arith.addf %9, %11 : vector<208x128xf32>
    %cst_5 = arith.constant 0.000000e+00 : f32
    %13 = vector.broadcast %cst_5 : f32 to vector<208x128xf32>
    %14 = arith.maximumf %12, %13 : vector<208x128xf32>
    %15 = arith.truncf %14 : vector<208x128xf32> to vector<208x128xbf16>
    %c0_6 = arith.constant 0 : index
    %c0_7 = arith.constant 0 : index
    %16 = vector.load %arg4[%c0_6, %c0_7] : memref<208x128xbf16, #tpu.memory_space<vmem>>, vector<208x128xbf16>
    tpu.vector_store %arg4[%c0_6, %c0_7], %15 {strides = array<i32>} : memref<208x128xbf16, #tpu.memory_space<vmem>>, vector<208x128xbf16>,
    return
  }
  func.func @transform_0(%arg0: i32) -> (i32, i32) {
    %c0_i32 = arith.constant 0 : i32
    %c0_i32_0 = arith.constant 0 : i32
    return %arg0, %c0_i32 : i32, i32
  }
  func.func @transform_1(%arg0: i32) -> (i32, i32) {
    %c0_i32 = arith.constant 0 : i32
    %c0_i32_0 = arith.constant 0 : i32
    %c0_i32_1 = arith.constant 0 : i32
    return %c0_i32, %c0_i32_0 : i32, i32
  }
  func.func @transform_2(%arg0: i32) -> (i32, i32) {
    %c0_i32 = arith.constant 0 : i32
    %c0_i32_0 = arith.constant 0 : i32
    %c0_i32_1 = arith.constant 0 : i32
    return %c0_i32, %c0_i32_0 : i32, i32
  }
  func.func @transform_3(%arg0: i32) -> (i32, i32) {
    %c0_i32 = arith.constant 0 : i32
    %c0_i32_0 = arith.constant 0 : i32
    return %arg0, %c0_i32 : i32, i32
  }
}

module attributes {stable_mosaic.version = 11 : i64} {
  func.func @_conv_pool_kernel(%arg0: i32, %arg1: memref<128x150xbf16, #tpu.memory_space<vmem>>, %arg2: memref<150x128xbf16, #tpu.memory_space<vmem>>, %arg3: memref<1x128xf32, #tpu.memory_space<vmem>>, %arg4: memref<32x128xbf16, #tpu.memory_space<vmem>>) attributes {dimension_semantics = [#tpu.dimension_semantics<parallel>], iteration_bounds = array<i64: 2>, scalar_prefetch = 0 : i64, scratch_operands = 0 : i64, tpu.core_type = #tpu.core_type<tc>, window_params = [{transform_indices = @transform_0, window_bounds = array<i64: 128, 150>}, {pipeline_mode = #tpu.pipeline_mode<synchronous>, transform_indices = @transform_1, window_bounds = array<i64: 150, 128>}, {pipeline_mode = #tpu.pipeline_mode<synchronous>, transform_indices = @transform_2, window_bounds = array<i64: 1, 128>}, {transform_indices = @transform_3, window_bounds = array<i64: 32, 128>}]} {
    %c0 = arith.constant 0 : index
    %c0_0 = arith.constant 0 : index
    %0 = vector.load %arg1[%c0, %c0_0] : memref<128x150xbf16, #tpu.memory_space<vmem>>, vector<128x150xbf16>
    %c0_1 = arith.constant 0 : index
    %c0_2 = arith.constant 0 : index
    %1 = vector.load %arg2[%c0_1, %c0_2] : memref<150x128xbf16, #tpu.memory_space<vmem>>, vector<150x128xbf16>
    %cst = arith.constant dense<0.000000e+00> : vector<128x128xf32>
    %2 = tpu.matmul %0, %1, %cst {dimension_numbers = #tpu.dot_dimension_numbers<[1], [0], [0], [1], [0, 0, 1, 1], [], []>} : vector<128x150xbf16>, vector<150x128xbf16>, vector<128x128xf32> -> vector<128x128xf32>
    %3 = vector.extract_strided_slice %2 {offsets = [0, 0], sizes = [32, 128], strides = [1, 1]} : vector<128x128xf32> to vector<32x128xf32>
    %4 = vector.extract_strided_slice %2 {offsets = [32, 0], sizes = [32, 128], strides = [1, 1]} : vector<128x128xf32> to vector<32x128xf32>
    %5 = arith.maximumf %3, %4 : vector<32x128xf32>
    %6 = vector.extract_strided_slice %2 {offsets = [64, 0], sizes = [32, 128], strides = [1, 1]} : vector<128x128xf32> to vector<32x128xf32>
    %7 = vector.extract_strided_slice %2 {offsets = [96, 0], sizes = [32, 128], strides = [1, 1]} : vector<128x128xf32> to vector<32x128xf32>
    %8 = arith.maximumf %6, %7 : vector<32x128xf32>
    %9 = arith.maximumf %5, %8 : vector<32x128xf32>
    %c0_3 = arith.constant 0 : index
    %c0_4 = arith.constant 0 : index
    %10 = vector.load %arg3[%c0_3, %c0_4] : memref<1x128xf32, #tpu.memory_space<vmem>>, vector<1x128xf32>
    %11 = vector.broadcast %10 : vector<1x128xf32> to vector<32x128xf32>
    %12 = arith.addf %9, %11 : vector<32x128xf32>
    %cst_5 = arith.constant 0.000000e+00 : f32
    %13 = vector.broadcast %cst_5 : f32 to vector<32x128xf32>
    %14 = arith.maximumf %12, %13 : vector<32x128xf32>
    %15 = arith.truncf %14 : vector<32x128xf32> to vector<32x128xbf16>
    %c0_6 = arith.constant 0 : index
    %c0_7 = arith.constant 0 : index
    %16 = vector.load %arg4[%c0_6, %c0_7] : memref<32x128xbf16, #tpu.memory_space<vmem>>, vector<32x128xbf16>
    tpu.vector_store %arg4[%c0_6, %c0_7], %15 {strides = array<i32>} : memref<32x128xbf16, #tpu.memory_space<vmem>>, vector<32x128xbf16>,
    return
  }
  func.func @transform_0(%arg0: i32) -> (i32, i32) {
    %c0_i32 = arith.constant 0 : i32
    %c0_i32_0 = arith.constant 0 : i32
    return %arg0, %c0_i32 : i32, i32
  }
  func.func @transform_1(%arg0: i32) -> (i32, i32) {
    %c0_i32 = arith.constant 0 : i32
    %c0_i32_0 = arith.constant 0 : i32
    %c0_i32_1 = arith.constant 0 : i32
    return %c0_i32, %c0_i32_0 : i32, i32
  }
  func.func @transform_2(%arg0: i32) -> (i32, i32) {
    %c0_i32 = arith.constant 0 : i32
    %c0_i32_0 = arith.constant 0 : i32
    %c0_i32_1 = arith.constant 0 : i32
    return %c0_i32, %c0_i32_0 : i32, i32
  }
  func.func @transform_3(%arg0: i32) -> (i32, i32) {
    %c0_i32 = arith.constant 0 : i32
    %c0_i32_0 = arith.constant 0 : i32
    return %arg0, %c0_i32 : i32, i32
  }
}

module attributes {stable_mosaic.version = 11 : i64} {
  func.func @_fc_kernel(%arg0: i32, %arg1: memref<16x400xbf16, #tpu.memory_space<vmem>>, %arg2: memref<400x128xbf16, #tpu.memory_space<vmem>>, %arg3: memref<1x128xf32, #tpu.memory_space<vmem>>, %arg4: memref<128x128xbf16, #tpu.memory_space<vmem>>, %arg5: memref<1x128xf32, #tpu.memory_space<vmem>>, %arg6: memref<16x128xf32, #tpu.memory_space<vmem>>) attributes {dimension_semantics = [#tpu.dimension_semantics<parallel>], iteration_bounds = array<i64: 1>, scalar_prefetch = 0 : i64, scratch_operands = 0 : i64, tpu.core_type = #tpu.core_type<tc>, window_params = [{transform_indices = @transform_0, window_bounds = array<i64: 16, 400>}, {pipeline_mode = #tpu.pipeline_mode<synchronous>, transform_indices = @transform_1, window_bounds = array<i64: 400, 128>}, {pipeline_mode = #tpu.pipeline_mode<synchronous>, transform_indices = @transform_2, window_bounds = array<i64: 1, 128>}, {pipeline_mode = #tpu.pipeline_mode<synchronous>, transform_indices = @transform_3, window_bounds = array<i64: 128, 128>}, {pipeline_mode = #tpu.pipeline_mode<synchronous>, transform_indices = @transform_4, window_bounds = array<i64: 1, 128>}, {transform_indices = @transform_5, window_bounds = array<i64: 16, 128>}]} {
    %c0 = arith.constant 0 : index
    %c0_0 = arith.constant 0 : index
    %0 = vector.load %arg1[%c0, %c0_0] : memref<16x400xbf16, #tpu.memory_space<vmem>>, vector<16x400xbf16>
    %c0_1 = arith.constant 0 : index
    %c0_2 = arith.constant 0 : index
    %1 = vector.load %arg2[%c0_1, %c0_2] : memref<400x128xbf16, #tpu.memory_space<vmem>>, vector<400x128xbf16>
    %cst = arith.constant dense<0.000000e+00> : vector<16x128xf32>
    %2 = tpu.matmul %0, %1, %cst {dimension_numbers = #tpu.dot_dimension_numbers<[1], [0], [0], [1], [0, 0, 1, 1], [], []>} : vector<16x400xbf16>, vector<400x128xbf16>, vector<16x128xf32> -> vector<16x128xf32>
    %c0_3 = arith.constant 0 : index
    %c0_4 = arith.constant 0 : index
    %3 = vector.load %arg3[%c0_3, %c0_4] : memref<1x128xf32, #tpu.memory_space<vmem>>, vector<1x128xf32>
    %4 = vector.broadcast %3 : vector<1x128xf32> to vector<16x128xf32>
    %5 = arith.addf %2, %4 : vector<16x128xf32>
    %cst_5 = arith.constant 0.000000e+00 : f32
    %6 = vector.broadcast %cst_5 : f32 to vector<16x128xf32>
    %7 = arith.maximumf %5, %6 : vector<16x128xf32>
    %8 = arith.truncf %7 : vector<16x128xf32> to vector<16x128xbf16>
    %c0_6 = arith.constant 0 : index
    %c0_7 = arith.constant 0 : index
    %9 = vector.load %arg4[%c0_6, %c0_7] : memref<128x128xbf16, #tpu.memory_space<vmem>>, vector<128x128xbf16>
    %cst_8 = arith.constant dense<0.000000e+00> : vector<16x128xf32>
    %10 = tpu.matmul %8, %9, %cst_8 {dimension_numbers = #tpu.dot_dimension_numbers<[1], [0], [0], [1], [0, 0, 1, 1], [], []>} : vector<16x128xbf16>, vector<128x128xbf16>, vector<16x128xf32> -> vector<16x128xf32>
    %c0_9 = arith.constant 0 : index
    %c0_10 = arith.constant 0 : index
    %11 = vector.load %arg5[%c0_9, %c0_10] : memref<1x128xf32, #tpu.memory_space<vmem>>, vector<1x128xf32>
    %12 = vector.broadcast %11 : vector<1x128xf32> to vector<16x128xf32>
    %13 = arith.addf %10, %12 : vector<16x128xf32>
    %c0_11 = arith.constant 0 : index
    %c0_12 = arith.constant 0 : index
    %14 = vector.load %arg6[%c0_11, %c0_12] : memref<16x128xf32, #tpu.memory_space<vmem>>, vector<16x128xf32>
    tpu.vector_store %arg6[%c0_11, %c0_12], %13 {strides = array<i32>} : memref<16x128xf32, #tpu.memory_space<vmem>>, vector<16x128xf32>,
    return
  }
  func.func @transform_0(%arg0: i32) -> (i32, i32) {
    %c0_i32 = arith.constant 0 : i32
    %c0_i32_0 = arith.constant 0 : i32
    return %arg0, %c0_i32 : i32, i32
  }
  func.func @transform_1(%arg0: i32) -> (i32, i32) {
    %c0_i32 = arith.constant 0 : i32
    %c0_i32_0 = arith.constant 0 : i32
    %c0_i32_1 = arith.constant 0 : i32
    return %c0_i32, %c0_i32_0 : i32, i32
  }
  func.func @transform_2(%arg0: i32) -> (i32, i32) {
    %c0_i32 = arith.constant 0 : i32
    %c0_i32_0 = arith.constant 0 : i32
    %c0_i32_1 = arith.constant 0 : i32
    return %c0_i32, %c0_i32_0 : i32, i32
  }
  func.func @transform_3(%arg0: i32) -> (i32, i32) {
    %c0_i32 = arith.constant 0 : i32
    %c0_i32_0 = arith.constant 0 : i32
    %c0_i32_1 = arith.constant 0 : i32
    return %c0_i32, %c0_i32_0 : i32, i32
  }
  func.func @transform_4(%arg0: i32) -> (i32, i32) {
    %c0_i32 = arith.constant 0 : i32
    %c0_i32_0 = arith.constant 0 : i32
    %c0_i32_1 = arith.constant 0 : i32
    return %c0_i32, %c0_i32_0 : i32, i32
  }
  func.func @transform_5(%arg0: i32) -> (i32, i32) {
    %c0_i32 = arith.constant 0 : i32
    %c0_i32_0 = arith.constant 0 : i32
    return %arg0, %c0_i32 : i32, i32
  }
}

</mosaic_0001>

<bundles_post_ra>
// kernel: lenet_forward.3
= control target key start
LH: loop header
LB: loop body
LE: loop exit
PB: predicated region body
PF: predicated region fallthrough
CT: control target
= control target key end

     0   :  { %s1730_s12 = smov 0   ;;  %s1921_s0 = inlined_call_operand.vmem [shape: bf16[1664,75], index: 0, kind: input, shape index: {}]   ;;  %s1922_s1 = inlined_call_operand.vmem [shape: bf16[75,128], index: 1, kind: input, shape index: {}]   ;;  %s1923_s2 = inlined_call_operand.vmem [shape: f32[1,128], index: 2, kind: input, shape index: {}]   ;;  %s1924_s3 = inlined_call_operand.vmem [shape: bf16[416,128], index: 3, kind: output, shape index: {}]  }
   0x1 LB: > { %s1253_s13 = sadd.s32 4294967295, %s1707_s12   ;;  %p1257_p0 = scmp.ge.s32.totalorder %s1707_s12, 1  ;;  %s1707_s12 = sphi %s1730_s12, %s13_s12  }
   0x2   : > { %p138_p1 = scmp.lt.s32.totalorder %s1707_s12, 3 }
   0x4   : > { %p139_p2 = pnand %p1257_p0, %p138_p1 }
   0x5   : > { %s162_s18 = smul.u32 (!%p139_p2), 104, %s1253_s13 }
   0x6   : > { %142 = sbr.rel (%p139_p2) target bundleno = 380 (0x17c), region = 32 }
   0x7   : > { %p163_p3 = scmp.lt.s32.totalorder (!%p139_p2), %s162_s18, 207  ;;  %s168_s4 = smul.u32 (!%p139_p2), 26, %s1253_s13 }
   0x9   : > { %p169_p4 = scmp.lt.s32.totalorder (!%p139_p2), %s168_s4, 51 }
   0xb   : > { %v1486_v0 = vld [vmem:[%s1922_s1 + $0x20] sm:$0xf]  ;;  %v1598_v1 = vld [vmem:[%s1922_s1 + $0x20] sm:$0x30]  ;;  %vm735_vm0 = vcmask 1044480   ;;  %vm736_vm1 = vcmask 1045504  }
   0xc   : > { %v1487_v2 = vor.u32 %v1598_v1, %v1486_v0  ;;  %v1709_v3 = vmov 65535   ;;  %v1597_v7 = vld [vmem:[%s1922_s1 + $0x18] sm:$0xff]  ;;  %v1596_v8 = vld [vmem:[%s1922_s1 + $0x10] sm:$0xff]  ;;  %s1926_s18 = smov (!%p163_p3, %s162_s18), 207  ;;  %v1595_v9 = vld [vmem:[%s1922_s1 + $0x8] sm:$0xff]  ;;  %vm578_vm2 = vcmask 613376  }
   0xd   : > { %v737_v4 = vsel %vm735_vm0, 4294967295, %v1709_v3  ;;  %s1258_s25 = sshll.u32 %s1926_s18, 2  ;;  %v1594_v10 = vld [vmem:[%s1922_s1] sm:$0xff]  ;;  %s1928_s4 = smov (!%p169_p4, %s168_s4), 51 }
   0xe   : > { %v738_v5 = vsel %vm736_vm1, %v737_v4, 0  ;;  %s1761_s30 = scalar_lea.vmem %s1921_s0, %s1258_s25  ;;  %v1840_v56 = vld [vmem:[%s1923_s2] ss:$0 sm:$0xff]  ;;  %s1259_s7 = sshll.u32 %s1928_s4, 2 }
   0xf   : > { %v740_v6 = vand.u32 %v1487_v2, %v738_v5  ;;  %v1542_v11 = vld [vmem:[%s1761_s30] sm:$0xff]  ;;  %v1555_v12 = vld [vmem:[%s1761_s30 + $0x68] sm:$0xff]  ;;  %v1568_v13 = vld [vmem:[%s1761_s30 + $0xd0] sm:$0xff]  ;;  %s1855_s10 = scalar_lea.vmem %s1924_s3, %s1259_s7 }
  0x10   : > { %v1581_v14 = vld [vmem:[%s1761_s30 + $0x138] sm:$0xff]  ;;  %v1543_v15 = vld [vmem:[%s1761_s30 + $0x8] sm:$0xff]  ;;  %v1556_v16 = vld [vmem:[%s1761_s30 + $0x70] sm:$0xff] }
  0x11   : > { %745 = vmatpush.bf16.msra.mxu0 %v740_v6  ;;  %1676 = vmatpush.bf16.msra.mxu1 %v740_v6  ;;  %v1569_v17 = vld [vmem:[%s1761_s30 + $0xd8] sm:$0xff]  ;;  %v1582_v18 = vld [vmem:[%s1761_s30 + $0x140] sm:$0xff]  ;;  %v1544_v19 = vld [vmem:[%s1761_s30 + $0x10] sm:$0xff] }
  0x12   : > { %1677 = vmatpush.bf16.msra.mxu2 %v740_v6  ;;  %1678 = vmatpush.bf16.msra.mxu3 %v740_v6  ;;  %v1557_v20 = vld [vmem:[%s1761_s30 + $0x78] sm:$0xff]  ;;  %v1570_v21 = vld [vmem:[%s1761_s30 + $0xe0] sm:$0xff]  ;;  %v1583_v22 = vld [vmem:[%s1761_s30 + $0x148] sm:$0xff] }
  0x13   : > { %v1545_v23 = vld [vmem:[%s1761_s30 + $0x18] sm:$0xff]  ;;  %v1558_v24 = vld [vmem:[%s1761_s30 + $0x80] sm:$0xff]  ;;  %v1571_v25 = vld [vmem:[%s1761_s30 + $0xe8] sm:$0xff] }
  0x14   : > { %v1584_v26 = vld [vmem:[%s1761_s30 + $0x150] sm:$0xff]  ;;  %v1546_v27 = vld [vmem:[%s1761_s30 + $0x20] sm:$0xff]  ;;  %v1559_v28 = vld [vmem:[%s1761_s30 + $0x88] sm:$0xff] }
  0x15   : > { %746 = vmatpush.bf16.msra.mxu0 %v1597_v7  ;;  %1679 = vmatpush.bf16.msra.mxu1 %v1597_v7  ;;  %v1572_v29 = vld [vmem:[%s1761_s30 + $0xf0] sm:$0xff]  ;;  %v1585_v30 = vld [vmem:[%s1761_s30 + $0x158] sm:$0xff]  ;;  %v1547_v31 = vld [vmem:[%s1761_s30 + $0x28] sm:$0xff] }
  0x16   : > { %1680 = vmatpush.bf16.msra.mxu2 %v1597_v7  ;;  %1681 = vmatpush.bf16.msra.mxu3 %v1597_v7  ;;  %v1560_v32 = vld [vmem:[%s1761_s30 + $0x90] sm:$0xff]  ;;  %v1573_v33 = vld [vmem:[%s1761_s30 + $0xf8] sm:$0xff]  ;;  %v1586_v34 = vld [vmem:[%s1761_s30 + $0x160] sm:$0xff] }
  0x17   : > { %v1548_v35 = vld [vmem:[%s1761_s30 + $0x30] sm:$0xff]  ;;  %v1561_v36 = vld [vmem:[%s1761_s30 + $0x98] sm:$0xff]  ;;  %v1574_v37 = vld [vmem:[%s1761_s30 + $0x100] sm:$0xff] }
  0x18   : > { %v1587_v38 = vld [vmem:[%s1761_s30 + $0x168] sm:$0xff]  ;;  %v1549_v39 = vld [vmem:[%s1761_s30 + $0x38] sm:$0xff]  ;;  %v1562_v40 = vld [vmem:[%s1761_s30 + $0xa0] sm:$0xff] }
  0x19   : > { %747 = vmatpush.bf16.msra.mxu0 %v1596_v8  ;;  %1682 = vmatpush.bf16.msra.mxu1 %v1596_v8  ;;  %v1575_v41 = vld [vmem:[%s1761_s30 + $0x108] sm:$0xff]  ;;  %v1588_v42 = vld [vmem:[%s1761_s30 + $0x170] sm:$0xff]  ;;  %v1550_v43 = vld [vmem:[%s1761_s30 + $0x40] sm:$0xff] }
  0x1a   : > { %1683 = vmatpush.bf16.msra.mxu2 %v1596_v8  ;;  %1684 = vmatpush.bf16.msra.mxu3 %v1596_v8  ;;  %v1563_v44 = vld [vmem:[%s1761_s30 + $0xa8] sm:$0xff]  ;;  %v1576_v47 = vld [vmem:[%s1761_s30 + $0x110] sm:$0xff]  ;;  %v1589_v48 = vld [vmem:[%s1761_s30 + $0x178] sm:$0xff] }
  0x1b   : > { %v1551_v59 = vld [vmem:[%s1761_s30 + $0x48] sm:$0xff]  ;;  %v1564_v60 = vld [vmem:[%s1761_s30 + $0xb0] sm:$0xff]  ;;  %v1577_v1 = vld [vmem:[%s1761_s30 + $0x118] sm:$0xff] }
  0x1c   : > { %v1590_v2 = vld [vmem:[%s1761_s30 + $0x180] sm:$0xff] }
  0x1d   : > { %748 = vmatpush.bf16.msra.mxu0 %v1595_v9  ;;  %1685 = vmatpush.bf16.msra.mxu1 %v1595_v9 }
  0x1e   : > { %1686 = vmatpush.bf16.msra.mxu2 %v1595_v9  ;;  %1687 = vmatpush.bf16.msra.mxu3 %v1595_v9 }
  0x21   : > { %749 = vmatpush.bf16.msra.mxu0 %v1594_v10  ;;  %1688 = vmatpush.bf16.msra.mxu1 %v1594_v10 }
  0x22   : > { %1689 = vmatpush.bf16.msra.mxu2 %v1594_v10  ;;  %1690 = vmatpush.bf16.msra.mxu3 %v1594_v10 }
  0x24   : > { %1488 = vmatmul.msk.bf16.vlgmr.msra.gmra.mxu0 %vm578_vm2, %v1542_v11  ;;  %1501 = vmatmul.msk.bf16.vlgmr.msra.gmra.mxu1 %vm578_vm2, %v1555_v12 }
  0x25   : > { %1514 = vmatmul.msk.bf16.vlgmr.msra.gmra.mxu2 %vm578_vm2, %v1568_v13  ;;  %1527 = vmatmul.msk.bf16.vlgmr.msra.gmra.mxu3 %vm578_vm2, %v1581_v14 }
  0x34   : > { %1489 = vmatmul.msk.bf16.gmra.mxu0 %vm578_vm2, %v1543_v15  ;;  %1502 = vmatmul.msk.bf16.gmra.mxu1 %vm578_vm2, %v1556_v16 }
  0x35   : > { %1515 = vmatmul.msk.bf16.gmra.mxu2 %vm578_vm2, %v1569_v17  ;;  %1528 = vmatmul.msk.bf16.gmra.mxu3 %vm578_vm2, %v1582_v18  ;;  %v1552_v18 = vld [vmem:[%s1761_s30 + $0x50] sm:$0xff] }
  0x44   : > { %1490 = vmatmul.msk.bf16.gmra.mxu0 %vm578_vm2, %v1544_v19  ;;  %1503 = vmatmul.msk.bf16.gmra.mxu1 %vm578_vm2, %v1557_v20  ;;  %v1565_v19 = vld [vmem:[%s1761_s30 + $0xb8] sm:$0xff] }
  0x45   : > { %1516 = vmatmul.msk.bf16.gmra.mxu2 %vm578_vm2, %v1570_v21  ;;  %1529 = vmatmul.msk.bf16.gmra.mxu3 %vm578_vm2, %v1583_v22 }
  0x54   : > { %1491 = vmatmul.msk.bf16.gmra.mxu0 %vm578_vm2, %v1545_v23  ;;  %1504 = vmatmul.msk.bf16.gmra.mxu1 %vm578_vm2, %v1558_v24  ;;  %v1578_v24 = vld [vmem:[%s1761_s30 + $0x120] sm:$0xff] }
  0x55   : > { %1517 = vmatmul.msk.bf16.gmra.mxu2 %vm578_vm2, %v1571_v25  ;;  %1530 = vmatmul.msk.bf16.gmra.mxu3 %vm578_vm2, %v1584_v26  ;;  %v1591_v25 = vld [vmem:[%s1761_s30 + $0x188] sm:$0xff] }
  0x64   : > { %1492 = vmatmul.msk.bf16.gmra.mxu0 %vm578_vm2, %v1546_v27  ;;  %1505 = vmatmul.msk.bf16.gmra.mxu1 %vm578_vm2, %v1559_v28 }
  0x65   : > { %1518 = vmatmul.msk.bf16.gmra.mxu2 %vm578_vm2, %v1572_v29  ;;  %1531 = vmatmul.msk.bf16.gmra.mxu3 %vm578_vm2, %v1585_v30 }
  0x74   : > { %1493 = vmatmul.msk.bf16.gmra.mxu0 %vm578_vm2, %v1547_v31  ;;  %1506 = vmatmul.msk.bf16.gmra.mxu1 %vm578_vm2, %v1560_v32 }
  0x75   : > { %1519 = vmatmul.msk.bf16.gmra.mxu2 %vm578_vm2, %v1573_v33  ;;  %1532 = vmatmul.msk.bf16.gmra.mxu3 %vm578_vm2, %v1586_v34 }
  0x84   : > { %1494 = vmatmul.msk.bf16.gmra.mxu0 %vm578_vm2, %v1548_v35  ;;  %1507 = vmatmul.msk.bf16.gmra.mxu1 %vm578_vm2, %v1561_v36 }
  0x85   : > { %1520 = vmatmul.msk.bf16.gmra.mxu2 %vm578_vm2, %v1574_v37  ;;  %1533 = vmatmul.msk.bf16.gmra.mxu3 %vm578_vm2, %v1587_v38 }
  0x94   : > { %1495 = vmatmul.msk.bf16.gmra.mxu0 %vm578_vm2, %v1549_v39  ;;  %1508 = vmatmul.msk.bf16.gmra.mxu1 %vm578_vm2, %v1562_v40 }
  0x95   : > { %1521 = vmatmul.msk.bf16.gmra.mxu2 %vm578_vm2, %v1575_v41  ;;  %1534 = vmatmul.msk.bf16.gmra.mxu3 %vm578_vm2, %v1588_v42  ;;  %v1553_v41 = vld [vmem:[%s1761_s30 + $0x58] sm:$0xff]  ;;  %v1566_v42 = vld [vmem:[%s1761_s30 + $0xc0] sm:$0xff] }
  0xa1   : > { %v751_v45 = vpop.f32.mrf.mxu0  ;;  %v816_v46 = vpop.f32.mrf.mxu1 }
  0xa2   : > { %v1011_v53 = vmax.f32 %v751_v45, %v816_v46 }
  0xa4   : > { %1496 = vmatmul.msk.bf16.gmra.mxu0 %vm578_vm2, %v1550_v43  ;;  %1509 = vmatmul.msk.bf16.gmra.mxu1 %vm578_vm2, %v1563_v44 }
  0xa5   : > { %1522 = vmatmul.msk.bf16.gmra.mxu2 %vm578_vm2, %v1576_v47  ;;  %1535 = vmatmul.msk.bf16.gmra.mxu3 %vm578_vm2, %v1589_v48  ;;  %v1579_v47 = vld [vmem:[%s1761_s30 + $0x128] sm:$0xff]  ;;  %v1592_v48 = vld [vmem:[%s1761_s30 + $0x190] sm:$0xff] }
  0xa8   : > { %v881_v49 = vpop.f32.mrf.mxu2  ;;  %v946_v50 = vpop.f32.mrf.mxu3 }
  0xa9   : > { %v753_v51 = vpop.f32.mrf.mxu0  ;;  %v818_v52 = vpop.f32.mrf.mxu1  ;;  %v1037_v54 = vmax.f32 %v881_v49, %v946_v50 }
  0xaa   : > { %v1012_v61 = vmax.f32 %v753_v51, %v818_v52 }
  0xab   : > { %v1063_v55 = vmax.f32 %v1011_v53, %v1037_v54 }
  0xad   : > { %v1093_v3 = vadd.f32 %v1840_v56, %v1063_v55 }
  0xaf   : > { %v1119_v6 = vmax.f32 %v1093_v3, 0.0 }
  0xb0   : > { %v883_v57 = vpop.f32.mrf.mxu2  ;;  %v948_v58 = vpop.f32.mrf.mxu3 }
  0xb1   : > { %v1038_v62 = vmax.f32 %v883_v57, %v948_v58  ;;  %v756_v63 = vpop.f32.mrf.mxu0  ;;  %v821_v0 = vpop.f32.mrf.mxu1 }
  0xb2   : > { %v1013_v13 = vmax.f32 %v756_v63, %v821_v0 }
  0xb3   : > { %v1064_v4 = vmax.f32 %v1012_v61, %v1038_v62 }
  0xb4   : > { %1497 = vmatmul.msk.bf16.gmra.mxu0 %vm578_vm2, %v1551_v59  ;;  %1510 = vmatmul.msk.bf16.gmra.mxu1 %vm578_vm2, %v1564_v60 }
  0xb5   : > { %v1094_v5 = vadd.f32 %v1840_v56, %v1064_v4  ;;  %1523 = vmatmul.msk.bf16.gmra.mxu2 %vm578_vm2, %v1577_v1  ;;  %1536 = vmatmul.msk.bf16.gmra.mxu3 %vm578_vm2, %v1590_v2  ;;  %v1554_v1 = vld [vmem:[%s1761_s30 + $0x60] sm:$0xff]  ;;  %v1567_v2 = vld [vmem:[%s1761_s30 + $0xc8] sm:$0xff] }
  0xb7   : > { %v1120_v7 = vmax.f32 %v1094_v5, 0.0 }
  0xb8   : > { %v886_v8 = vpop.f32.mrf.mxu2  ;;  %v951_v9 = vpop.f32.mrf.mxu3 }
  0xb9   : > { %v1602_v10 = vpack.c.bf16 %v1120_v7, %v1119_v6  ;;  %v758_v11 = vpop.f32.mrf.mxu0  ;;  %v823_v12 = vpop.f32.mrf.mxu1  ;;  %v1039_v14 = vmax.f32 %v886_v8, %v951_v9  ;;  %v1580_v7 = vld [vmem:[%s1761_s30 + $0x130] sm:$0xff]  ;;  %v1593_v8 = vld [vmem:[%s1761_s30 + $0x198] sm:$0xff] }
  0xba   : > { %v1014_v20 = vmax.f32 %v758_v11, %v823_v12 }
  0xbb   : > { %1603 = vst [vmem:[%s1855_s10] sm:$0xff] %v1602_v10   ;;  %v1065_v15 = vmax.f32 %v1013_v13, %v1039_v14 }
  0xbd   : > { %v1095_v26 = vadd.f32 %v1840_v56, %v1065_v15 }
  0xbf   : > { %v1121_v29 = vmax.f32 %v1095_v26, 0.0 }
  0xc0   : > { %v888_v16 = vpop.f32.mrf.mxu2  ;;  %v953_v17 = vpop.f32.mrf.mxu3 }
  0xc1   : > { %v1040_v21 = vmax.f32 %v888_v16, %v953_v17  ;;  %v761_v22 = vpop.f32.mrf.mxu0  ;;  %v826_v23 = vpop.f32.mrf.mxu1 }
  0xc2   : > { %v1015_v36 = vmax.f32 %v761_v22, %v826_v23 }
  0xc3   : > { %v1066_v27 = vmax.f32 %v1014_v20, %v1040_v21 }
  0xc4   : > { %1498 = vmatmul.msk.bf16.gmra.mxu0 %vm578_vm2, %v1552_v18  ;;  %1511 = vmatmul.msk.bf16.gmra.mxu1 %vm578_vm2, %v1565_v19 }
  0xc5   : > { %v1096_v28 = vadd.f32 %v1840_v56, %v1066_v27  ;;  %1524 = vmatmul.msk.bf16.gmra.mxu2 %vm578_vm2, %v1578_v24  ;;  %1537 = vmatmul.msk.bf16.gmra.mxu3 %vm578_vm2, %v1591_v25 }
  0xc7   : > { %v1122_v30 = vmax.f32 %v1096_v28, 0.0 }
  0xc8   : > { %v891_v31 = vpop.f32.mrf.mxu2  ;;  %v956_v32 = vpop.f32.mrf.mxu3 }
  0xc9   : > { %v1607_v33 = vpack.c.bf16 %v1122_v30, %v1121_v29  ;;  %v763_v34 = vpop.f32.mrf.mxu0  ;;  %v828_v35 = vpop.f32.mrf.mxu1  ;;  %v1041_v37 = vmax.f32 %v891_v31, %v956_v32 }
  0xca   : > { %v1016_v43 = vmax.f32 %v763_v34, %v828_v35 }
  0xcb   : > { %1664 = vst [vmem:[%s1855_s10 + $0x8] sm:$0xff] %v1607_v33   ;;  %v1067_v38 = vmax.f32 %v1015_v36, %v1041_v37 }
  0xcd   : > { %v1097_v49 = vadd.f32 %v1840_v56, %v1067_v38 }
  0xcf   : > { %v1123_v52 = vmax.f32 %v1097_v49, 0.0 }
  0xd0   : > { %v893_v39 = vpop.f32.mrf.mxu2  ;;  %v958_v40 = vpop.f32.mrf.mxu3 }
  0xd1   : > { %v1042_v44 = vmax.f32 %v893_v39, %v958_v40  ;;  %v766_v45 = vpop.f32.mrf.mxu0  ;;  %v831_v46 = vpop.f32.mrf.mxu1 }
  0xd2   : > { %v1017_v60 = vmax.f32 %v766_v45, %v831_v46 }
  0xd3   : > { %v1068_v50 = vmax.f32 %v1016_v43, %v1042_v44 }
  0xd4   : > { %1499 = vmatmul.msk.bf16.gmra.mxu0 %vm578_vm2, %v1553_v41  ;;  %1512 = vmatmul.msk.bf16.gmra.mxu1 %vm578_vm2, %v1566_v42 }
  0xd5   : > { %v1098_v51 = vadd.f32 %v1840_v56, %v1068_v50  ;;  %1525 = vmatmul.msk.bf16.gmra.mxu2 %vm578_vm2, %v1579_v47  ;;  %1538 = vmatmul.msk.bf16.gmra.mxu3 %vm578_vm2, %v1592_v48 }
  0xd7   : > { %v1124_v53 = vmax.f32 %v1098_v51, 0.0 }
  0xd8   : > { %v896_v54 = vpop.f32.mrf.mxu2  ;;  %v961_v55 = vpop.f32.mrf.mxu3 }
  0xd9   : > { %v1612_v57 = vpack.c.bf16 %v1124_v53, %v1123_v52  ;;  %v768_v58 = vpop.f32.mrf.mxu0  ;;  %v833_v59 = vpop.f32.mrf.mxu1  ;;  %v1043_v61 = vmax.f32 %v896_v54, %v961_v55 }
  0xda   : > { %v1018_v3 = vmax.f32 %v768_v58, %v833_v59 }
  0xdb   : > { %1665 = vst [vmem:[%s1855_s10 + $0x10] sm:$0xff] %v1612_v57   ;;  %v1069_v62 = vmax.f32 %v1017_v60, %v1043_v61 }
  0xdd   : > { %v1099_v9 = vadd.f32 %v1840_v56, %v1069_v62 }
  0xdf   : > { %v1125_v12 = vmax.f32 %v1099_v9, 0.0 }
  0xe0   : > { %v898_v63 = vpop.f32.mrf.mxu2  ;;  %v963_v0 = vpop.f32.mrf.mxu3 }
  0xe1   : > { %v1044_v4 = vmax.f32 %v898_v63, %v963_v0  ;;  %v771_v5 = vpop.f32.mrf.mxu0  ;;  %v836_v6 = vpop.f32.mrf.mxu1 }
  0xe2   : > { %v1019_v19 = vmax.f32 %v771_v5, %v836_v6 }
  0xe3   : > { %v1070_v10 = vmax.f32 %v1018_v3, %v1044_v4 }
  0xe4   : > { %1500 = vmatmul.msk.bf16.gmra.mxu0 %vm578_vm2, %v1554_v1  ;;  %1513 = vmatmul.msk.bf16.gmra.mxu1 %vm578_vm2, %v1567_v2 }
  0xe5   : > { %v1100_v11 = vadd.f32 %v1840_v56, %v1070_v10  ;;  %1526 = vmatmul.msk.bf16.gmra.mxu2 %vm578_vm2, %v1580_v7  ;;  %1539 = vmatmul.msk.bf16.gmra.mxu3 %vm578_vm2, %v1593_v8 }
  0xe7   : > { %v1126_v13 = vmax.f32 %v1100_v11, 0.0 }
  0xe8   : > { %v901_v14 = vpop.f32.mrf.mxu2  ;;  %v966_v15 = vpop.f32.mrf.mxu3 }
  0xe9   : > { %v1617_v16 = vpack.c.bf16 %v1126_v13, %v1125_v12  ;;  %v773_v17 = vpop.f32.mrf.mxu0  ;;  %v838_v18 = vpop.f32.mrf.mxu1  ;;  %v1045_v20 = vmax.f32 %v901_v14, %v966_v15 }
  0xea   : > { %v1020_v24 = vmax.f32 %v773_v17, %v838_v18 }
  0xeb   : > { %1666 = vst [vmem:[%s1855_s10 + $0x18] sm:$0xff] %v1617_v16   ;;  %v1071_v21 = vmax.f32 %v1019_v19, %v1045_v20 }
  0xed   : > { %v1101_v28 = vadd.f32 %v1840_v56, %v1071_v21 }
  0xef   : > { %v1127_v31 = vmax.f32 %v1101_v28, 0.0 }
  0xf0   : > { %v903_v22 = vpop.f32.mrf.mxu2  ;;  %v968_v23 = vpop.f32.mrf.mxu3 }
  0xf1   : > { %v1046_v25 = vmax.f32 %v903_v22, %v968_v23  ;;  %v776_v26 = vpop.f32.mrf.mxu0  ;;  %v841_v27 = vpop.f32.mrf.mxu1 }
  0xf2   : > { %v1021_v38 = vmax.f32 %v776_v26, %v841_v27 }
  0xf3   : > { %v1072_v29 = vmax.f32 %v1020_v24, %v1046_v25 }
  0xf5   : > { %v1102_v30 = vadd.f32 %v1840_v56, %v1072_v29 }
  0xf7   : > { %v1128_v32 = vmax.f32 %v1102_v30, 0.0 }
  0xf8   : > { %v906_v33 = vpop.f32.mrf.mxu2  ;;  %v971_v34 = vpop.f32.mrf.mxu3 }
  0xf9   : > { %v1622_v35 = vpack.c.bf16 %v1128_v32, %v1127_v31  ;;  %v778_v36 = vpop.f32.mrf.mxu0  ;;  %v843_v37 = vpop.f32.mrf.mxu1  ;;  %v1047_v39 = vmax.f32 %v906_v33, %v971_v34 }
  0xfa   : > { %v1022_v43 = vmax.f32 %v778_v36, %v843_v37 }
  0xfb   : > { %1667 = vst [vmem:[%s1855_s10 + $0x20] sm:$0xff] %v1622_v35   ;;  %v1073_v40 = vmax.f32 %v1021_v38, %v1047_v39 }
  0xfd   : > { %v1103_v47 = vadd.f32 %v1840_v56, %v1073_v40 }
  0xff   : > { %v1129_v50 = vmax.f32 %v1103_v47, 0.0 }
 0x100   : > { %v908_v41 = vpop.f32.mrf.mxu2  ;;  %v973_v42 = vpop.f32.mrf.mxu3 }
 0x101   : > { %v1048_v44 = vmax.f32 %v908_v41, %v973_v42  ;;  %v781_v45 = vpop.f32.mrf.mxu0  ;;  %v846_v46 = vpop.f32.mrf.mxu1 }
 0x102   : > { %v1023_v58 = vmax.f32 %v781_v45, %v846_v46 }
 0x103   : > { %v1074_v48 = vmax.f32 %v1022_v43, %v1048_v44 }
 0x105   : > { %v1104_v49 = vadd.f32 %v1840_v56, %v1074_v48 }
 0x107   : > { %v1130_v51 = vmax.f32 %v1104_v49, 0.0 }
 0x108   : > { %v911_v52 = vpop.f32.mrf.mxu2  ;;  %v976_v53 = vpop.f32.mrf.mxu3 }
 0x109   : > { %v1627_v54 = vpack.c.bf16 %v1130_v51, %v1129_v50  ;;  %v783_v55 = vpop.f32.mrf.mxu0  ;;  %v848_v57 = vpop.f32.mrf.mxu1  ;;  %v1049_v59 = vmax.f32 %v911_v52, %v976_v53 }
 0x10a   : > { %v1024_v63 = vmax.f32 %v783_v55, %v848_v57 }
 0x10b   : > { %1668 = vst [vmem:[%s1855_s10 + $0x28] sm:$0xff] %v1627_v54   ;;  %v1075_v60 = vmax.f32 %v1023_v58, %v1049_v59 }
 0x10d   : > { %v1105_v3 = vadd.f32 %v1840_v56, %v1075_v60 }
 0x10f   : > { %v1131_v6 = vmax.f32 %v1105_v3, 0.0 }
 0x110   : > { %v913_v61 = vpop.f32.mrf.mxu2  ;;  %v978_v62 = vpop.f32.mrf.mxu3 }
 0x111   : > { %v1050_v0 = vmax.f32 %v913_v61, %v978_v62  ;;  %v786_v1 = vpop.f32.mrf.mxu0  ;;  %v851_v2 = vpop.f32.mrf.mxu1 }
 0x112   : > { %v1025_v13 = vmax.f32 %v786_v1, %v851_v2 }
 0x113   : > { %v1076_v4 = vmax.f32 %v1024_v63, %v1050_v0 }
 0x115   : > { %v1106_v5 = vadd.f32 %v1840_v56, %v1076_v4 }
 0x117   : > { %v1132_v7 = vmax.f32 %v1106_v5, 0.0 }
 0x118   : > { %v916_v8 = vpop.f32.mrf.mxu2  ;;  %v981_v9 = vpop.f32.mrf.mxu3 }
 0x119   : > { %v1632_v10 = vpack.c.bf16 %v1132_v7, %v1131_v6  ;;  %v788_v11 = vpop.f32.mrf.mxu0  ;;  %v853_v12 = vpop.f32.mrf.mxu1  ;;  %v1051_v14 = vmax.f32 %v916_v8, %v981_v9 }
 0x11a   : > { %v1026_v18 = vmax.f32 %v788_v11, %v853_v12 }
 0x11b   : > { %1669 = vst [vmem:[%s1855_s10 + $0x30] sm:$0xff] %v1632_v10   ;;  %v1077_v15 = vmax.f32 %v1025_v13, %v1051_v14 }
 0x11d   : > { %v1107_v22 = vadd.f32 %v1840_v56, %v1077_v15 }
 0x11f   : > { %v1133_v25 = vmax.f32 %v1107_v22, 0.0 }
 0x120   : > { %v918_v16 = vpop.f32.mrf.mxu2  ;;  %v983_v17 = vpop.f32.mrf.mxu3 }
 0x121   : > { %v1052_v19 = vmax.f32 %v918_v16, %v983_v17  ;;  %v791_v20 = vpop.f32.mrf.mxu0  ;;  %v856_v21 = vpop.f32.mrf.mxu1 }
 0x122   : > { %v1027_v32 = vmax.f32 %v791_v20, %v856_v21 }
 0x123   : > { %v1078_v23 = vmax.f32 %v1026_v18, %v1052_v19 }
 0x125   : > { %v1108_v24 = vadd.f32 %v1840_v56, %v1078_v23 }
 0x127   : > { %v1134_v26 = vmax.f32 %v1108_v24, 0.0 }
 0x128   : > { %v921_v27 = vpop.f32.mrf.mxu2  ;;  %v986_v28 = vpop.f32.mrf.mxu3 }
 0x129   : > { %v1637_v29 = vpack.c.bf16 %v1134_v26, %v1133_v25  ;;  %v793_v30 = vpop.f32.mrf.mxu0  ;;  %v858_v31 = vpop.f32.mrf.mxu1  ;;  %v1053_v33 = vmax.f32 %v921_v27, %v986_v28 }
 0x12a   : > { %v1028_v37 = vmax.f32 %v793_v30, %v858_v31 }
 0x12b   : > { %1670 = vst [vmem:[%s1855_s10 + $0x38] sm:$0xff] %v1637_v29   ;;  %v1079_v34 = vmax.f32 %v1027_v32, %v1053_v33 }
 0x12d   : > { %v1109_v41 = vadd.f32 %v1840_v56, %v1079_v34 }
 0x12f   : > { %v1135_v44 = vmax.f32 %v1109_v41, 0.0 }
 0x130   : > { %v923_v35 = vpop.f32.mrf.mxu2  ;;  %v988_v36 = vpop.f32.mrf.mxu3 }
 0x131   : > { %v1054_v38 = vmax.f32 %v923_v35, %v988_v36  ;;  %v796_v39 = vpop.f32.mrf.mxu0  ;;  %v861_v40 = vpop.f32.mrf.mxu1 }
 0x132   : > { %v1029_v51 = vmax.f32 %v796_v39, %v861_v40 }
 0x133   : > { %v1080_v42 = vmax.f32 %v1028_v37, %v1054_v38 }
 0x135   : > { %v1110_v43 = vadd.f32 %v1840_v56, %v1080_v42 }
 0x137   : > { %v1136_v45 = vmax.f32 %v1110_v43, 0.0 }
 0x138   : > { %v926_v46 = vpop.f32.mrf.mxu2  ;;  %v991_v47 = vpop.f32.mrf.mxu3 }
 0x139   : > { %v1642_v48 = vpack.c.bf16 %v1136_v45, %v1135_v44  ;;  %v798_v49 = vpop.f32.mrf.mxu0  ;;  %v863_v50 = vpop.f32.mrf.mxu1  ;;  %v1055_v52 = vmax.f32 %v926_v46, %v991_v47 }
 0x13a   : > { %v1030_v57 = vmax.f32 %v798_v49, %v863_v50 }
 0x13b   : > { %1671 = vst [vmem:[%s1855_s10 + $0x40] sm:$0xff] %v1642_v48   ;;  %v1081_v53 = vmax.f32 %v1029_v51, %v1055_v52 }
 0x13d   : > { %v1111_v61 = vadd.f32 %v1840_v56, %v1081_v53 }
 0x13f   : > { %v1137_v0 = vmax.f32 %v1111_v61, 0.0 }
 0x140   : > { %v928_v54 = vpop.f32.mrf.mxu2  ;;  %v993_v55 = vpop.f32.mrf.mxu3 }
 0x141   : > { %v1056_v58 = vmax.f32 %v928_v54, %v993_v55  ;;  %v801_v59 = vpop.f32.mrf.mxu0  ;;  %v866_v60 = vpop.f32.mrf.mxu1 }
 0x142   : > { %v1031_v7 = vmax.f32 %v801_v59, %v866_v60 }
 0x143   : > { %v1082_v62 = vmax.f32 %v1030_v57, %v1056_v58 }
 0x145   : > { %v1112_v63 = vadd.f32 %v1840_v56, %v1082_v62 }
 0x147   : > { %v1138_v1 = vmax.f32 %v1112_v63, 0.0 }
 0x148   : > { %v931_v2 = vpop.f32.mrf.mxu2  ;;  %v996_v3 = vpop.f32.mrf.mxu3 }
 0x149   : > { %v1647_v4 = vpack.c.bf16 %v1138_v1, %v1137_v0  ;;  %v803_v5 = vpop.f32.mrf.mxu0  ;;  %v868_v6 = vpop.f32.mrf.mxu1  ;;  %v1057_v8 = vmax.f32 %v931_v2, %v996_v3 }
 0x14a   : > { %v1032_v12 = vmax.f32 %v803_v5, %v868_v6 }
 0x14b   : > { %1672 = vst [vmem:[%s1855_s10 + $0x48] sm:$0xff] %v1647_v4   ;;  %v1083_v9 = vmax.f32 %v1031_v7, %v1057_v8 }
 0x14d   : > { %v1113_v16 = vadd.f32 %v1840_v56, %v1083_v9 }
 0x14f   : > { %v1139_v19 = vmax.f32 %v1113_v16, 0.0 }
 0x150   : > { %v933_v10 = vpop.f32.mrf.mxu2  ;;  %v998_v11 = vpop.f32.mrf.mxu3 }
 0x151   : > { %v1058_v13 = vmax.f32 %v933_v10, %v998_v11  ;;  %v806_v14 = vpop.f32.mrf.mxu0  ;;  %v871_v15 = vpop.f32.mrf.mxu1 }
 0x152   : > { %v1033_v26 = vmax.f32 %v806_v14, %v871_v15 }
 0x153   : > { %v1084_v17 = vmax.f32 %v1032_v12, %v1058_v13 }
 0x155   : > { %v1114_v18 = vadd.f32 %v1840_v56, %v1084_v17 }
 0x157   : > { %v1140_v20 = vmax.f32 %v1114_v18, 0.0 }
 0x158   : > { %v936_v21 = vpop.f32.mrf.mxu2  ;;  %v1001_v22 = vpop.f32.mrf.mxu3 }
 0x159   : > { %v1652_v23 = vpack.c.bf16 %v1140_v20, %v1139_v19  ;;  %v808_v24 = vpop.f32.mrf.mxu0  ;;  %v873_v25 = vpop.f32.mrf.mxu1  ;;  %v1059_v27 = vmax.f32 %v936_v21, %v1001_v22 }
 0x15a   : > { %v1034_v31 = vmax.f32 %v808_v24, %v873_v25 }
 0x15b   : > { %1673 = vst [vmem:[%s1855_s10 + $0x50] sm:$0xff] %v1652_v23   ;;  %v1085_v28 = vmax.f32 %v1033_v26, %v1059_v27 }
 0x15d   : > { %v1115_v33 = vadd.f32 %v1840_v56, %v1085_v28 }
 0x15f   : > { %v1141_v38 = vmax.f32 %v1115_v33, 0.0 }
 0x160   : > { %v938_v29 = vpop.f32.mrf.mxu2  ;;  %v1003_v30 = vpop.f32.mrf.mxu3 }
 0x161   : > { %v1060_v32 = vmax.f32 %v938_v29, %v1003_v30  ;;  %v811_v35 = vpop.f32.mrf.mxu0  ;;  %v876_v36 = vpop.f32.mrf.mxu1 }
 0x162   : > { %v1035_v43 = vmax.f32 %v811_v35, %v876_v36 }
 0x163   : > { %v1086_v34 = vmax.f32 %v1034_v31, %v1060_v32 }
 0x165   : > { %v1116_v37 = vadd.f32 %v1840_v56, %v1086_v34 }
 0x167   : > { %v1142_v39 = vmax.f32 %v1116_v37, 0.0 }
 0x168   : > { %v941_v40 = vpop.f32.mrf.mxu2  ;;  %v1006_v41 = vpop.f32.mrf.mxu3 }
 0x169   : > { %v1657_v42 = vpack.c.bf16 %v1142_v39, %v1141_v38  ;;  %v1061_v44 = vmax.f32 %v941_v40, %v1006_v41  ;;  %v813_v45 = vpop.f32.mrf.mxu0  ;;  %v878_v46 = vpop.f32.mrf.mxu1 }
 0x16a   : > { %v1036_v50 = vmax.f32 %v813_v45, %v878_v46 }
 0x16b   : > { %1674 = vst [vmem:[%s1855_s10 + $0x58] sm:$0xff] %v1657_v42   ;;  %v1087_v47 = vmax.f32 %v1035_v43, %v1061_v44 }
 0x16d   : > { %v1117_v52 = vadd.f32 %v1840_v56, %v1087_v47 }
 0x16f   : > { %v1143_v55 = vmax.f32 %v1117_v52, 0.0 }
 0x170   : > { %v943_v48 = vpop.f32.mrf.mxu2  ;;  %v1008_v49 = vpop.f32.mrf.mxu3 }
 0x171   : > { %v1062_v51 = vmax.f32 %v943_v48, %v1008_v49 }
 0x173   : > { %v1088_v53 = vmax.f32 %v1036_v50, %v1062_v51 }
 0x175   : > { %v1118_v54 = vadd.f32 %v1840_v56, %v1088_v53 }
 0x177   : > { %v1144_v57 = vmax.f32 %v1118_v54, 0.0 }
 0x179   : > { %v1662_v58 = vpack.c.bf16 %v1144_v57, %v1143_v55 }
 0x17b   : > { %1675 = vst [vmem:[%s1855_s10 + $0x60] sm:$0xff] %v1662_v58  }
 0x17c PF: > { %s13_s12 = sadd.s32 1, %s1707_s12  }
 0x17d   : > { %p10_p5 = scmp.ge.s32.totalorder %s13_s12, 4  }
 0x17f   :  { %12 = sbr.rel (!%p10_p5) target bundleno = 1 (0x1), region = 62 }

// kernel: lenet_forward.4
= control target key start
LH: loop header
LB: loop body
LE: loop exit
PB: predicated region body
PF: predicated region fallthrough
CT: control target
= control target key end

     0   :  { %s761_s12 = smov 0   ;;  %s857_s0 = inlined_call_operand.vmem [shape: bf16[256,150], index: 0, kind: input, shape index: {}]   ;;  %s858_s1 = inlined_call_operand.vmem [shape: bf16[150,128], index: 1, kind: input, shape index: {}]   ;;  %s859_s2 = inlined_call_operand.vmem [shape: f32[1,128], index: 2, kind: input, shape index: {}]   ;;  %s860_s3 = inlined_call_operand.vmem [shape: bf16[64,128], index: 3, kind: output, shape index: {}]  }
   0x1 LB: > { %s557_s13 = sadd.s32 4294967295, %s739_s12   ;;  %p561_p0 = scmp.ge.s32.totalorder %s739_s12, 1  ;;  %s739_s12 = sphi %s761_s12, %s13_s12  }
   0x2   : > { %p139_p1 = scmp.lt.s32.totalorder %s739_s12, 3 }
   0x4   : > { %p140_p2 = pnand %p561_p0, %p139_p1 }
   0x5   : > { %s562_s18 = sshll.u32 (!%p140_p2), %s557_s13, 4  ;;  %s565_s14 = sshll.u32 (!%p140_p2), %s557_s13, 2 }
   0x6   : > { %143 = sbr.rel (%p140_p2) target bundleno = 245 (0xf5), region = 32  ;;  %p165_p3 = scmp.lt.s32.totalorder (!%p140_p2), %s562_s18, 31 }
   0x7   : > { %p172_p4 = scmp.lt.s32.totalorder (!%p140_p2), %s565_s14, 7 }
   0xb   : > { %v701_v0 = vld [vmem:[%s858_s1 + $0x38] sm:$0xff]  ;;  %v212_v1 = vld [vmem:[%s858_s1 + $0x48] sm:$0x7]  ;;  %vm367_vm0 = vcmask 1042432   ;;  %v700_v3 = vld [vmem:[%s858_s1 + $0x30] sm:$0xff]  ;;  %s862_s18 = smov (!%p165_p3, %s562_s18), 31 }
   0xc   : > { %v322_v2 = vunpack.c.l.b16 %v212_v1  ;;  %371 = vmatpush.bf16.msra.mxu0 %v701_v0  ;;  %714 = vmatpush.bf16.msra.mxu2 %v701_v0  ;;  %s677_s21 = sshll.u32 %s862_s18, 3  ;;  %v702_v6 = vld [vmem:[%s858_s1 + $0x40] sm:$0xff]  ;;  %v699_v7 = vld [vmem:[%s858_s1 + $0x28] sm:$0xff]  ;;  %vm342_vm1 = vcmask 179200   ;;  %v697_v15 = vld [vmem:[%s858_s1 + $0x18] sm:$0xff]  ;;  %s864_s14 = smov (!%p172_p4, %s565_s14), 7 }
   0xd   : > { %s789_s28 = scalar_lea.vmem %s857_s0, %s677_s21  ;;  %v698_v12 = vld [vmem:[%s858_s1 + $0x20] sm:$0xff]  ;;  %v696_v16 = vld [vmem:[%s858_s1 + $0x10] sm:$0xff]  ;;  %v695_v17 = vld [vmem:[%s858_s1 + $0x8] sm:$0xff]  ;;  %s566_s13 = sshll.u32 %s864_s14, 2 }
   0xe   : > { %v332_v4 = vpack.c.b16 %v322_v2, %v322_v2  ;;  %v678_v8 = vld [vmem:[%s789_s28 + $0x4] sm:$0xf]  ;;  %v571_v9 = vld [vmem:[%s789_s28 + $0x8] sm:$0xf0]  ;;  %v688_v11 = vld [vmem:[%s789_s28 + $0x54] sm:$0xf]  ;;  %s175_s19 = scalar_lea.vmem %s860_s3, %s566_s13 }
   0xf   : > { %v574_v10 = vor.u32 %v678_v8, %v571_v9  ;;  %v611_v13 = vld [vmem:[%s789_s28 + $0x58] sm:$0xf0]  ;;  %v680_v18 = vld [vmem:[%s789_s28 + $0x14] sm:$0xf]  ;;  %v690_v20 = vld [vmem:[%s789_s28 + $0x64] sm:$0xf] }
  0x10   : > { %v369_v5 = vsel %vm367_vm0, %v332_v4, 0  ;;  %372 = vmatpush.bf16.msra.mxu0 %v700_v3  ;;  %715 = vmatpush.bf16.msra.mxu2 %v700_v3  ;;  %v614_v14 = vor.u32 %v688_v11, %v611_v13  ;;  %v579_v19 = vld [vmem:[%s789_s28 + $0x18] sm:$0xf0]  ;;  %v619_v21 = vld [vmem:[%s789_s28 + $0x68] sm:$0xf0]  ;;  %v694_v23 = vld [vmem:[%s858_s1] sm:$0xff] }
  0x11   : > { %426 = vmatpush.bf16.msra.mxu1 %v369_v5  ;;  %722 = vmatpush.bf16.msra.mxu3 %v369_v5  ;;  %v582_v22 = vor.u32 %v680_v18, %v579_v19  ;;  %v569_v24 = vld [vmem:[%s789_s28] sm:$0xf]  ;;  %v679_v25 = vld [vmem:[%s789_s28 + $0x4] sm:$0xf0]  ;;  %v622_v26 = vor.u32 %v690_v20, %v619_v21  ;;  %v682_v31 = vld [vmem:[%s789_s28 + $0x24] sm:$0xf] }
  0x12   : > { %v601_v27 = vld [vmem:[%s789_s28 + $0x40] sm:$0xf]  ;;  %v687_v28 = vld [vmem:[%s789_s28 + $0x44] sm:$0xf0]  ;;  %v570_v29 = vor.u32 %v679_v25, %v569_v24  ;;  %v587_v32 = vld [vmem:[%s789_s28 + $0x28] sm:$0xf0] }
  0x13   : > { %v602_v30 = vor.u32 %v687_v28, %v601_v27  ;;  %v692_v33 = vld [vmem:[%s789_s28 + $0x74] sm:$0xf]  ;;  %v627_v34 = vld [vmem:[%s789_s28 + $0x78] sm:$0xf0]  ;;  %v590_v35 = vor.u32 %v682_v31, %v587_v32  ;;  %v577_v36 = vld [vmem:[%s789_s28 + $0x10] sm:$0xf] }
  0x14   : > { %373 = vmatpush.bf16.msra.mxu0 %v699_v7  ;;  %716 = vmatpush.bf16.msra.mxu2 %v699_v7  ;;  %v681_v37 = vld [vmem:[%s789_s28 + $0x14] sm:$0xf0]  ;;  %v630_v38 = vor.u32 %v692_v33, %v627_v34  ;;  %v609_v39 = vld [vmem:[%s789_s28 + $0x50] sm:$0xf]  ;;  %v684_v43 = vld [vmem:[%s789_s28 + $0x34] sm:$0xf] }
  0x15   : > { %427 = vmatpush.bf16.msra.mxu1 %v702_v6  ;;  %723 = vmatpush.bf16.msra.mxu3 %v702_v6  ;;  %v689_v40 = vld [vmem:[%s789_s28 + $0x54] sm:$0xf0]  ;;  %v578_v41 = vor.u32 %v681_v37, %v577_v36  ;;  %v595_v44 = vld [vmem:[%s789_s28 + $0x38] sm:$0xf0]  ;;  %v585_v46 = vld [vmem:[%s789_s28 + $0x20] sm:$0xf] }
  0x16   : > { %v610_v42 = vor.u32 %v689_v40, %v609_v39  ;;  %v598_v45 = vor.u32 %v684_v43, %v595_v44  ;;  %v683_v47 = vld [vmem:[%s789_s28 + $0x24] sm:$0xf0]  ;;  %v617_v48 = vld [vmem:[%s789_s28 + $0x60] sm:$0xf]  ;;  %v686_v52 = vld [vmem:[%s789_s28 + $0x44] sm:$0xf] }
  0x17   : > { %v691_v49 = vld [vmem:[%s789_s28 + $0x64] sm:$0xf0]  ;;  %v586_v50 = vor.u32 %v683_v47, %v585_v46  ;;  %v603_v53 = vld [vmem:[%s789_s28 + $0x48] sm:$0xf0]  ;;  %v593_v55 = vld [vmem:[%s789_s28 + $0x30] sm:$0xf] }
  0x18   : > { %667 = vmatmul.msk.bf16.vlgmr.msra.gmra.mxu1 %vm342_vm1, %v574_v10  ;;  %374 = vmatpush.bf16.msra.mxu0 %v698_v12  ;;  %v618_v51 = vor.u32 %v691_v49, %v617_v48  ;;  %v606_v54 = vor.u32 %v686_v52, %v603_v53  ;;  %v685_v56 = vld [vmem:[%s789_s28 + $0x34] sm:$0xf0]  ;;  %v625_v57 = vld [vmem:[%s789_s28 + $0x70] sm:$0xf]  ;;  %v732_v33 = vld [vmem:[%s859_s2] ss:$0 sm:$0xff] }
  0x19   : > { %672 = vmatmul.msk.bf16.vlgmr.msra.gmra.mxu3 %vm342_vm1, %v614_v14  ;;  %717 = vmatpush.bf16.msra.mxu2 %v698_v12  ;;  %v693_v58 = vld [vmem:[%s789_s28 + $0x74] sm:$0xf0]  ;;  %v594_v59 = vor.u32 %v685_v56, %v593_v55 }
  0x1a   : > { %v626_v60 = vor.u32 %v693_v58, %v625_v57 }
  0x1c   : > { %375 = vmatpush.bf16.msra.mxu0 %v697_v15 }
  0x1d   : > { %718 = vmatpush.bf16.msra.mxu2 %v697_v15 }
  0x20   : > { %376 = vmatpush.bf16.msra.mxu0 %v696_v16 }
  0x21   : > { %719 = vmatpush.bf16.msra.mxu2 %v696_v16 }
  0x24   : > { %377 = vmatpush.bf16.msra.mxu0 %v695_v17 }
  0x25   : > { %720 = vmatpush.bf16.msra.mxu2 %v695_v17 }
  0x28   : > { %668 = vmatmul.msk.bf16.gmra.mxu1 %vm342_vm1, %v582_v22  ;;  %378 = vmatpush.bf16.msra.mxu0 %v694_v23 }
  0x29   : > { %673 = vmatmul.msk.bf16.gmra.mxu3 %vm342_vm1, %v622_v26  ;;  %721 = vmatpush.bf16.msra.mxu2 %v694_v23 }
  0x2b   : > { %379 = vmatmul.bf16.vlgmr.msra.gmra.mxu0 %v570_v29 }
  0x2c   : > { %399 = vmatmul.bf16.vlgmr.msra.gmra.mxu2 %v602_v30 }
  0x38   : > { %669 = vmatmul.msk.bf16.gmra.mxu1 %vm342_vm1, %v590_v35 }
  0x39   : > { %674 = vmatmul.msk.bf16.gmra.mxu3 %vm342_vm1, %v630_v38 }
  0x3b   : > { %384 = vmatmul.bf16.gmra.mxu0 %v578_v41 }
  0x3c   : > { %404 = vmatmul.bf16.gmra.mxu2 %v610_v42 }
  0x48   : > { %670 = vmatmul.msk.bf16.gmra.mxu1 %vm342_vm1, %v598_v45 }
  0x4b   : > { %389 = vmatmul.bf16.gmra.mxu0 %v586_v50 }
  0x4c   : > { %409 = vmatmul.bf16.gmra.mxu2 %v618_v51 }
  0x58   : > { %671 = vmatmul.msk.bf16.gmra.mxu1 %vm342_vm1, %v606_v54 }
  0x5b   : > { %394 = vmatmul.bf16.gmra.mxu0 %v594_v59 }
  0x5c   : > { %414 = vmatmul.bf16.gmra.mxu2 %v626_v60 }
  0x95   : > { %v429_v61 = vpop.f32.mrf.mxu1 }
  0x9c   : > { %v454_v5 = vpop.f32.mrf.mxu3 }
  0x9d   : > { %v431_v62 = vpop.f32.mrf.mxu1 }
  0xa4   : > { %v456_v10 = vpop.f32.mrf.mxu3 }
  0xa5   : > { %v434_v63 = vpop.f32.mrf.mxu1 }
  0xa8   : > { %v380_v0 = vpop.f32.mrf.mxu0 }
  0xa9   : > { %v430_v25 = vadd.f32 %v429_v61, %v380_v0 }
  0xac   : > { %v459_v15 = vpop.f32.mrf.mxu3 }
  0xad   : > { %v436_v1 = vpop.f32.mrf.mxu1 }
  0xaf   : > { %v400_v2 = vpop.f32.mrf.mxu2 }
  0xb0   : > { %v382_v3 = vpop.f32.mrf.mxu0 }
  0xb1   : > { %v432_v31 = vadd.f32 %v431_v62, %v382_v3 }
  0xb4   : > { %v461_v19 = vpop.f32.mrf.mxu3 }
  0xb5   : > { %v439_v4 = vpop.f32.mrf.mxu1 }
  0xb7   : > { %v402_v6 = vpop.f32.mrf.mxu2 }
  0xb8   : > { %v385_v7 = vpop.f32.mrf.mxu0 }
  0xb9   : > { %v435_v47 = vadd.f32 %v434_v63, %v385_v7 }
  0xbc   : > { %v464_v35 = vpop.f32.mrf.mxu3 }
  0xbd   : > { %v441_v8 = vpop.f32.mrf.mxu1 }
  0xbf   : > { %v405_v9 = vpop.f32.mrf.mxu2 }
  0xc0   : > { %v387_v11 = vpop.f32.mrf.mxu0  ;;  %v455_v43 = vadd.f32 %v454_v5, %v405_v9 }
  0xc1   : > { %v437_v56 = vadd.f32 %v436_v1, %v387_v11 }
  0xc4   : > { %v466_v54 = vpop.f32.mrf.mxu3 }
  0xc5   : > { %v444_v12 = vpop.f32.mrf.mxu1 }
  0xc7   : > { %v407_v13 = vpop.f32.mrf.mxu2 }
  0xc8   : > { %v390_v14 = vpop.f32.mrf.mxu0  ;;  %v457_v57 = vadd.f32 %v456_v10, %v407_v13 }
  0xc9   : > { %v440_v22 = vadd.f32 %v439_v4, %v390_v14 }
  0xcb   : > { %v469_v28 = vmax.f32 %v430_v25, %v440_v22 }
  0xcd   : > { %v446_v16 = vpop.f32.mrf.mxu1 }
  0xcf   : > { %v410_v17 = vpop.f32.mrf.mxu2 }
  0xd0   : > { %v392_v18 = vpop.f32.mrf.mxu0  ;;  %v460_v23 = vadd.f32 %v459_v15, %v410_v17 }
  0xd1   : > { %v442_v29 = vadd.f32 %v441_v8, %v392_v18 }
  0xd3   : > { %v470_v37 = vmax.f32 %v432_v31, %v442_v29 }
  0xd5   : > { %v449_v20 = vpop.f32.mrf.mxu1 }
  0xd6   : > { %v450_v21 = vadd.f32 %v449_v20, %v400_v2 }
  0xd7   : > { %v412_v24 = vpop.f32.mrf.mxu2 }
  0xd8   : > { %v473_v26 = vmax.f32 %v450_v21, %v460_v23  ;;  %v395_v27 = vpop.f32.mrf.mxu0  ;;  %v462_v34 = vadd.f32 %v461_v19, %v412_v24 }
  0xd9   : > { %v445_v44 = vadd.f32 %v444_v12, %v395_v27 }
  0xda   : > { %v477_v32 = vmax.f32 %v469_v28, %v473_v26 }
  0xdb   : > { %v471_v51 = vmax.f32 %v435_v47, %v445_v44 }
  0xdc   : > { %v485_v41 = vadd.f32 %v732_v33, %v477_v32 }
  0xdd   : > { %v451_v30 = vpop.f32.mrf.mxu1 }
  0xde   : > { %v452_v36 = vadd.f32 %v451_v30, %v402_v6  ;;  %v489_v49 = vmax.f32 %v485_v41, 0.0 }
  0xdf   : > { %v415_v39 = vpop.f32.mrf.mxu2 }
  0xe0   : > { %v474_v38 = vmax.f32 %v452_v36, %v462_v34  ;;  %v465_v40 = vadd.f32 %v464_v35, %v415_v39  ;;  %v397_v46 = vpop.f32.mrf.mxu0 }
  0xe1   : > { %v447_v52 = vadd.f32 %v446_v16, %v397_v46 }
  0xe2   : > { %v478_v42 = vmax.f32 %v470_v37, %v474_v38  ;;  %v475_v48 = vmax.f32 %v455_v43, %v465_v40 }
  0xe3   : > { %v472_v60 = vmax.f32 %v437_v56, %v447_v52 }
  0xe4   : > { %v486_v45 = vadd.f32 %v732_v33, %v478_v42  ;;  %v479_v58 = vmax.f32 %v471_v51, %v475_v48 }
  0xe6   : > { %v490_v50 = vmax.f32 %v486_v45, 0.0  ;;  %v487_v62 = vadd.f32 %v732_v33, %v479_v58 }
  0xe7   : > { %v417_v55 = vpop.f32.mrf.mxu2 }
  0xe8   : > { %v706_v53 = vpack.c.bf16 %v490_v50, %v489_v49  ;;  %v467_v59 = vadd.f32 %v466_v54, %v417_v55  ;;  %v491_v2 = vmax.f32 %v487_v62, 0.0 }
  0xea   : > { %707 = vst [vmem:[%s175_s19] sm:$0xff] %v706_v53   ;;  %v476_v61 = vmax.f32 %v457_v57, %v467_v59 }
  0xec   : > { %v480_v63 = vmax.f32 %v472_v60, %v476_v61 }
  0xee   : > { %v488_v0 = vadd.f32 %v732_v33, %v480_v63 }
  0xf0   : > { %v492_v3 = vmax.f32 %v488_v0, 0.0 }
  0xf2   : > { %v711_v4 = vpack.c.bf16 %v492_v3, %v491_v2 }
  0xf4   : > { %713 = vst [vmem:[%s175_s19 + $0x8] sm:$0xff] %v711_v4  }
  0xf5 PF: > { %s13_s12 = sadd.s32 1, %s739_s12  }
  0xf6   : > { %p10_p5 = scmp.ge.s32.totalorder %s13_s12, 4  }
  0xf8   :  { %12 = sbr.rel (!%p10_p5) target bundleno = 1 (0x1), region = 62 }

// kernel: lenet_forward.5
= control target key start
LH: loop header
LB: loop body
LE: loop exit
PB: predicated region body
PF: predicated region fallthrough
CT: control target
= control target key end

     0   :  { %vm248_vm0 = vcmask 130048   ;;  %s752_s1 = inlined_call_operand.vmem [shape: bf16[400,128], index: 1, kind: input, shape index: {}]   ;;  %s753_s0 = inlined_call_operand.vmem [shape: bf16[16,400], index: 0, kind: input, shape index: {}]   ;;  %s754_s3 = inlined_call_operand.vmem [shape: bf16[128,128], index: 3, kind: input, shape index: {}]   ;;  %s755_s2 = inlined_call_operand.vmem [shape: f32[1,128], index: 2, kind: input, shape index: {}]   ;;  %s756_s4 = inlined_call_operand.vmem [shape: f32[1,128], index: 4, kind: input, shape index: {}]   ;;  %s757_s5 = inlined_call_operand.vmem [shape: f32[16,128], index: 5, kind: output, shape index: {}]  }
   0x1   :  { %v559_v0 = vld [vmem:[%s752_s1 + $0x38] sm:$0xff]  ;;  %v558_v3 = vld [vmem:[%s752_s1 + $0x30] sm:$0xff]  ;;  %v557_v6 = vld [vmem:[%s752_s1 + $0x28] sm:$0xff] }
   0x2   :  { %v567_v1 = vld [vmem:[%s752_s1 + $0x78] sm:$0xff]  ;;  %252 = vmatpush.bf16.msra.mxu0 %v559_v0  ;;  %v566_v4 = vld [vmem:[%s752_s1 + $0x70] sm:$0xff]  ;;  %v565_v7 = vld [vmem:[%s752_s1 + $0x68] sm:$0xff] }
   0x3   :  { %v575_v2 = vld [vmem:[%s752_s1 + $0xb8] sm:$0xff]  ;;  %266 = vmatpush.bf16.msra.mxu1 %v567_v1  ;;  %v574_v5 = vld [vmem:[%s752_s1 + $0xb0] sm:$0xff]  ;;  %v576_v8 = vld [vmem:[%s752_s1 + $0xc0] sm:$0xff] }
   0x4   :  { %280 = vmatpush.bf16.msra.mxu2 %v575_v2  ;;  %v573_v9 = vld [vmem:[%s752_s1 + $0xa8] sm:$0xff]  ;;  %v411_v11 = vld [vmem:[%s753_s0 + $0x18] sm:$0xf0]  ;;  %301 = vmatpush.bf16.msra.mxu3 %v576_v8  ;;  %v556_v13 = vld [vmem:[%s752_s1 + $0x20] sm:$0xff] }
   0x5   :  { %v549_v10 = vld [vmem:[%s753_s0 + $0xc] sm:$0xf]  ;;  %v564_v14 = vld [vmem:[%s752_s1 + $0x60] sm:$0xff]  ;;  %v584_v16 = vld [vmem:[%s754_s3 + $0x38] sm:$0xff] }
   0x6   :  { %253 = vmatpush.bf16.msra.mxu0 %v558_v3  ;;  %v414_v12 = vor.u32 %v549_v10, %v411_v11  ;;  %v572_v15 = vld [vmem:[%s752_s1 + $0xa0] sm:$0xff]  ;;  %v583_v17 = vld [vmem:[%s754_s3 + $0x30] sm:$0xff]  ;;  %v555_v18 = vld [vmem:[%s752_s1 + $0x18] sm:$0xff] }
   0x7   :  { %267 = vmatpush.bf16.msra.mxu1 %v566_v4  ;;  %v563_v19 = vld [vmem:[%s752_s1 + $0x58] sm:$0xff]  ;;  %v554_v21 = vld [vmem:[%s752_s1 + $0x10] sm:$0xff]  ;;  %v553_v24 = vld [vmem:[%s752_s1 + $0x8] sm:$0xff] }
   0x8   :  { %281 = vmatpush.bf16.msra.mxu2 %v574_v5  ;;  %515 = vmatmul.msk.bf16.vlgmr.msra.gmra.mxu3 %vm248_vm0, %v414_v12  ;;  %v571_v20 = vld [vmem:[%s752_s1 + $0x98] sm:$0xff]  ;;  %v562_v22 = vld [vmem:[%s752_s1 + $0x50] sm:$0xff]  ;;  %v561_v25 = vld [vmem:[%s752_s1 + $0x48] sm:$0xff] }
   0x9   :  { %379 = vmatpush.bf16.msrb.mxu3 %v584_v16  ;;  %v570_v23 = vld [vmem:[%s752_s1 + $0x90] sm:$0xff]  ;;  %v569_v26 = vld [vmem:[%s752_s1 + $0x88] sm:$0xff]  ;;  %v552_v27 = vld [vmem:[%s752_s1] sm:$0xff] }
   0xa   :  { %254 = vmatpush.bf16.msra.mxu0 %v557_v6  ;;  %v560_v28 = vld [vmem:[%s752_s1 + $0x40] sm:$0xff]  ;;  %v550_v30 = vld [vmem:[%s753_s0 + $0xc] sm:$0xf0]  ;;  %v403_v32 = vld [vmem:[%s753_s0 + $0x10] sm:$0xf0] }
   0xb   :  { %268 = vmatpush.bf16.msra.mxu1 %v565_v7  ;;  %v401_v29 = vld [vmem:[%s753_s0] sm:$0xf]  ;;  %v548_v31 = vld [vmem:[%s753_s0 + $0x4] sm:$0xf]  ;;  %v409_v34 = vld [vmem:[%s753_s0 + $0x8] sm:$0xf] }
   0xc   :  { %282 = vmatpush.bf16.msra.mxu2 %v573_v9  ;;  %v568_v33 = vld [vmem:[%s752_s1 + $0x80] sm:$0xff]  ;;  %v551_v35 = vld [vmem:[%s753_s0 + $0x14] sm:$0xf0]  ;;  %v402_v36 = vor.u32 %v550_v30, %v401_v29  ;;  %v406_v37 = vor.u32 %v548_v31, %v403_v32  ;;  %v582_v39 = vld [vmem:[%s754_s3 + $0x28] sm:$0xff] }
   0xd   :  { %380 = vmatpush.bf16.msrb.mxu3 %v583_v17  ;;  %v410_v38 = vor.u32 %v551_v35, %v409_v34  ;;  %v581_v40 = vld [vmem:[%s754_s3 + $0x20] sm:$0xff]  ;;  %v580_v41 = vld [vmem:[%s754_s3 + $0x18] sm:$0xff]  ;;  %v579_v42 = vld [vmem:[%s754_s3 + $0x10] sm:$0xff] }
   0xe   :  { %255 = vmatpush.bf16.msra.mxu0 %v556_v13  ;;  %v578_v43 = vld [vmem:[%s754_s3 + $0x8] sm:$0xff]  ;;  %v577_v44 = vld [vmem:[%s754_s3] sm:$0xff] }
   0xf   :  { %269 = vmatpush.bf16.msra.mxu1 %v564_v14  ;;  %v585_v45 = vld [vmem:[%s755_s2] ss:$0 sm:$0xff] }
  0x10   :  { %283 = vmatpush.bf16.msra.mxu2 %v572_v15  ;;  %v586_v1 = vld [vmem:[%s756_s4] ss:$0 sm:$0xff] }
  0x11   :  { %381 = vmatpush.bf16.msrb.mxu3 %v582_v39 }
  0x12   :  { %256 = vmatpush.bf16.msra.mxu0 %v555_v18 }
  0x13   :  { %270 = vmatpush.bf16.msra.mxu1 %v563_v19 }
  0x14   :  { %284 = vmatpush.bf16.msra.mxu2 %v571_v20 }
  0x15   :  { %382 = vmatpush.bf16.msrb.mxu3 %v581_v40 }
  0x16   :  { %257 = vmatpush.bf16.msra.mxu0 %v554_v21 }
  0x17   :  { %271 = vmatpush.bf16.msra.mxu1 %v562_v22 }
  0x18   :  { %285 = vmatpush.bf16.msra.mxu2 %v570_v23 }
  0x19   :  { %383 = vmatpush.bf16.msrb.mxu3 %v580_v41 }
  0x1a   :  { %258 = vmatpush.bf16.msra.mxu0 %v553_v24 }
  0x1b   :  { %272 = vmatpush.bf16.msra.mxu1 %v561_v25 }
  0x1c   :  { %286 = vmatpush.bf16.msra.mxu2 %v569_v26 }
  0x1d   :  { %384 = vmatpush.bf16.msrb.mxu3 %v579_v42 }
  0x1e   :  { %259 = vmatpush.bf16.msra.mxu0 %v552_v27 }
  0x1f   :  { %273 = vmatpush.bf16.msra.mxu1 %v560_v28 }
  0x20   :  { %287 = vmatpush.bf16.msra.mxu2 %v568_v33 }
  0x21   :  { %260 = vmatmul.bf16.vlgmr.msra.gmra.mxu0 %v402_v36  ;;  %385 = vmatpush.bf16.msrb.mxu3 %v578_v43 }
  0x22   :  { %274 = vmatmul.bf16.vlgmr.msra.gmra.mxu1 %v406_v37 }
  0x23   :  { %288 = vmatmul.bf16.vlgmr.msra.gmra.mxu2 %v410_v38 }
  0x25   :  { %386 = vmatpush.bf16.msrb.mxu3 %v577_v44 }
  0x8b   :  { %v303_v49 = vpop.f32.mrf.mxu3 }
  0x93   :  { %v305_v60 = vpop.f32.mrf.mxu3 }
  0x9e   :  { %v261_v46 = vpop.f32.mrf.mxu0 }
  0x9f   :  { %v275_v47 = vpop.f32.mrf.mxu1  ;;  %v262_v48 = vadd.f32 %v585_v45, %v261_v46 }
  0xa1   :  { %v276_v51 = vadd.f32 %v275_v47, %v262_v48 }
  0xa6   :  { %v289_v50 = vpop.f32.mrf.mxu2  ;;  %v263_v52 = vpop.f32.mrf.mxu0 }
  0xa7   :  { %v264_v53 = vadd.f32 %v585_v45, %v263_v52  ;;  %v290_v54 = vadd.f32 %v289_v50, %v276_v51  ;;  %v277_v55 = vpop.f32.mrf.mxu1 }
  0xa9   :  { %v278_v56 = vadd.f32 %v277_v55, %v264_v53  ;;  %v304_v58 = vadd.f32 %v303_v49, %v290_v54 }
  0xab   :  { %v308_v62 = vmax.f32 %v304_v58, 0.0 }
  0xae   :  { %v291_v57 = vpop.f32.mrf.mxu2 }
  0xaf   :  { %v292_v59 = vadd.f32 %v291_v57, %v278_v56 }
  0xb1   :  { %v306_v61 = vadd.f32 %v305_v60, %v292_v59 }
  0xb3   :  { %v309_v63 = vmax.f32 %v306_v61, 0.0 }
  0xb5   :  { %v310_v0 = vpack.c.bf16 %v309_v63, %v308_v62 }
  0xb7   :  { %387 = vmatmul.bf16.vlgmr.msrb.gmra.mxu3 %v310_v0 }
 0x13a   :  { %v388_v2 = vpop.f32.mrf.mxu3 }
 0x13b   :  { %v389_v3 = vadd.f32 %v586_v1, %v388_v2 }
 0x13d   :  { %393 = vst [vmem:[%s757_s5] sm:$0xff] %v389_v3 }
 0x142   :  { %v390_v4 = vpop.f32.mrf.mxu3 }
 0x143   :  { %v391_v5 = vadd.f32 %v586_v1, %v390_v4 }
 0x145   :  { %394 = vst [vmem:[%s757_s5 + $0x8] sm:$0xff] %v391_v5 }

</bundles_post_ra>
